<compile_context>
chip_gen: v7x
topology: tpu7x:2x2x1
jax: 0.10.0
libtpu: 0.0.40
codegen_flags: <defaults>
</compile_context>

<pallas_src>
import functools

import jax
import jax.numpy as jnp
from jax import lax
from jax.experimental import pallas as pl
from jax.experimental.pallas import tpu as pltpu

N_CLUSTERS = 512     # module-level constant in the reference source
MODEL_DIM = 128      # dim used by the experiment that instantiates the module


def _round_up(x, mult):
    return (x + mult - 1) // mult * mult


def _choose_tm(m, max_tm=1024):
    """Token-tile rows: big for DMA efficiency, but >=2 grid steps when possible
    (v7x megacore), always a multiple of 8 (sublane alignment)."""
    half = pl.cdiv(m, 2)
    if half <= 128:
        tm = _round_up(max(half, 8), 8)
    else:
        tm = _round_up(half, 128)
    return min(max_tm, tm)


def _choose_subtile(tm):
    """Compute sub-tile rows: 128-256 keeps the one-hot live range small."""
    for stm in (256, 128, 64, 32, 16, 8):
        if tm % stm == 0:
            return stm
    return tm


def _embed_kernel(n_clusters, stm, n_sub, idx_ref, table_ref, out_ref):
    # idx_ref  : (TM, 1)           int32 cluster indices for this token tile
    # table_ref: (n_clusters, D)   embedding table (resident across the grid)
    # out_ref  : (TM, D)           gathered embeddings
    table = table_ref[...]                                            # hoisted
    cols = lax.broadcasted_iota(jnp.int32, (stm, n_clusters), 1)      # hoisted

    def body(s, carry):
        start = pl.multiple_of(s * stm, stm)
        idx = idx_ref[pl.ds(start, stm), :]                           # (stm, 1)
        onehot = (idx == cols).astype(table.dtype)                    # (stm, K)
        out_ref[pl.ds(start, stm), :] = jnp.dot(
            onehot, table, preferred_element_type=jnp.float32
        ).astype(out_ref.dtype)
        return carry

    lax.fori_loop(0, n_sub, body, 0, unroll=True)


def embed_cluster_centers(indices, table, *, max_tm=1024):
    """nn.Embedding forward: integer `indices` of any shape -> (*indices.shape, dim)."""
    n_clusters, dim = table.shape
    flat = indices.reshape(-1).astype(jnp.int32)
    m = flat.shape[0]

    tm = _choose_tm(m, max_tm)
    stm = _choose_subtile(tm)
    n_sub = tm // stm
    m_pad = pl.cdiv(m, tm) * tm

    if m_pad != m:
        flat = jnp.pad(flat, (0, m_pad - m))        # pad with index 0 (valid row)
    idx2d = flat.reshape(m_pad, 1)

    out_bytes = m_pad * dim * jnp.dtype(table.dtype).itemsize
    cost = pl.CostEstimate(
        flops=2 * m_pad * n_clusters * dim,
        bytes_accessed=m_pad * 4 + n_clusters * dim * jnp.dtype(table.dtype).itemsize + out_bytes,
        transcendentals=0,
    )

    out = pl.pallas_call(
        functools.partial(_embed_kernel, n_clusters, stm, n_sub),
        out_shape=jax.ShapeDtypeStruct((m_pad, dim), table.dtype),
        grid=(m_pad // tm,),
        in_specs=[
            # token-tile of indices, marches with the grid
            pl.BlockSpec((tm, 1), lambda i: (i, 0)),
            # whole table; block index constant -> DMA'd once, stays in VMEM
            # TODO(synk): if n_clusters grows to multi-MiB, single-buffer this
            # spec / add a K grid axis + accumulator (v7x 32 MiB scoped VMEM).
            pl.BlockSpec((n_clusters, dim), lambda i: (0, 0)),
        ],
        out_specs=pl.BlockSpec((tm, dim), lambda i: (i, 0)),
        compiler_params=pltpu.CompilerParams(
            dimension_semantics=("parallel",)),
        cost_estimate=cost,
    )(idx2d, table)

    if m_pad != m:
        out = out[:m]
    return out.reshape(*indices.shape, dim)


if __name__ == "__main__":
    key = jax.random.PRNGKey(0)
    k_idx, k_emb = jax.random.split(key)

    B, L = 2, 64                                        # small shapes: batch=2, seq=64
    indices = jax.random.randint(k_idx, (B, L), 0, N_CLUSTERS, dtype=jnp.int32)
    table = jax.random.normal(k_emb, (N_CLUSTERS, MODEL_DIM), jnp.float32) * 0.1

    fwd = jax.jit(embed_cluster_centers)
    out = jax.block_until_ready(fwd(indices, table))

    # correctness vs. the plain-JAX reference of nn.Embedding.forward
    ref = table[indices]
    assert out.shape == (B, L, MODEL_DIM), out.shape
    assert bool(jnp.all(jnp.isfinite(out)))
    assert bool(jnp.allclose(out, ref, atol=1e-5, rtol=1e-5)), float(
        jnp.max(jnp.abs(out - ref)))

    # sanity-check the large-M path too (big tile + inner sub-tile loop + padding)
    big_idx = jax.random.randint(k_idx, (3, 700), 0, N_CLUSTERS, dtype=jnp.int32)
    big_out = jax.block_until_ready(jax.jit(embed_cluster_centers)(big_idx, table))
    assert bool(jnp.allclose(big_out, table[big_idx], atol=1e-5, rtol=1e-5))

    print("KERNEL_OK")
</pallas_src>

<mosaic_0001>
module attributes {stable_mosaic.version = 11 : i64} {
  func.func @_embed_kernel(%arg0: i32, %arg1: memref<64x1xi32, #tpu.memory_space<vmem>>, %arg2: memref<512x128xf32, #tpu.memory_space<vmem>>, %arg3: memref<64x128xf32, #tpu.memory_space<vmem>>) attributes {dimension_semantics = [#tpu.dimension_semantics<parallel>], iteration_bounds = array<i64: 2>, scalar_prefetch = 0 : i64, scratch_operands = 0 : i64, tpu.core_type = #tpu.core_type<tc>, window_params = [{transform_indices = @transform_0, window_bounds = array<i64: 64, 1>}, {pipeline_mode = #tpu.pipeline_mode<synchronous>, transform_indices = @transform_1, window_bounds = array<i64: 512, 128>}, {transform_indices = @transform_2, window_bounds = array<i64: 64, 128>}]} {
    %c0 = arith.constant 0 : index
    %c0_0 = arith.constant 0 : index
    %0 = vector.load %arg2[%c0, %c0_0] : memref<512x128xf32, #tpu.memory_space<vmem>>, vector<512x128xf32>
    %1 = tpu.iota {dimensions = array<i32: 1>} : vector<64x512xi32>
    %c0_i32 = arith.constant 0 : i32
    %c64_i32 = arith.constant 64 : i32
    %2 = arith.muli %c0_i32, %c64_i32 : i32
    %3 = tpu.assume_multiple %2, 64 : i32
    %4 = arith.index_cast %3 : i32 to index
    %c0_1 = arith.constant 0 : index
    %5 = vector.load %arg1[%4, %c0_1] : memref<64x1xi32, #tpu.memory_space<vmem>>, vector<64x1xi32>
    %6 = vector.broadcast %5 : vector<64x1xi32> to vector<64x512xi32>
    %7 = arith.cmpi eq, %6, %1 : vector<64x512xi32>
    %8 = arith.extui %7 : vector<64x512xi1> to vector<64x512xi32>
    %9 = arith.sitofp %8 : vector<64x512xi32> to vector<64x512xf32>
    %cst = arith.constant dense<0.000000e+00> : vector<64x128xf32>
    %10 = tpu.matmul %9, %0, %cst {dimension_numbers = #tpu.dot_dimension_numbers<[1], [0], [0], [1], [0, 0, 1, 1], [], []>} : vector<64x512xf32>, vector<512x128xf32>, vector<64x128xf32> -> vector<64x128xf32>
    %11 = arith.index_cast %3 : i32 to index
    %c0_2 = arith.constant 0 : index
    %12 = vector.load %arg3[%11, %c0_2] : memref<64x128xf32, #tpu.memory_space<vmem>>, vector<64x128xf32>
    tpu.vector_store %arg3[%11, %c0_2], %10 {strides = array<i32>} : memref<64x128xf32, #tpu.memory_space<vmem>>, vector<64x128xf32>,
    %c1_i32 = arith.constant 1 : i32
    return
  }
  func.func @transform_0(%arg0: i32) -> (i32, i32) {
    %c0_i32 = arith.constant 0 : i32
    %c0_i32_0 = arith.constant 0 : i32
    return %arg0, %c0_i32 : i32, i32
  }
  func.func @transform_1(%arg0: i32) -> (i32, i32) {
    %c0_i32 = arith.constant 0 : i32
    %c0_i32_0 = arith.constant 0 : i32
    %c0_i32_1 = arith.constant 0 : i32
    return %c0_i32, %c0_i32_0 : i32, i32
  }
  func.func @transform_2(%arg0: i32) -> (i32, i32) {
    %c0_i32 = arith.constant 0 : i32
    %c0_i32_0 = arith.constant 0 : i32
    return %arg0, %c0_i32 : i32, i32
  }
}

</mosaic_0001>

<bundles_post_ra>
// kernel: embed_cluster_centers.1
= control target key start
LH: loop header
LB: loop body
LE: loop exit
PB: predicated region body
PF: predicated region fallthrough
CT: control target
= control target key end

     0   :  { %7 = vsyncpa [#allocation3], 0  ;;  %s1332_s0 = inlined_call_operand.vmem [shape: s32[128,1], index: 0, kind: input, shape index: {}]   ;;  %s1333_s1 = inlined_call_operand.hbm [shape: f32[512,128], index: 1, kind: input, shape index: {}]   ;;  %s1334_s2 = inlined_call_operand.hbm [shape: f32[128,128], index: 2, kind: output, shape index: {}]  }
   0x1   :  { %8 = vsyncpa [#allocation4], 0 }
   0x2   :  { %10 = vsyncpa [#allocation4 + $0x1], 0  ;;  %s1095_s9 = smov 0   ;;  %s1097_s10 = smov 0  }
   0x3   :  { %s1099_s11 = smov 0   ;;  %s1101_s12 = smov 0  }
   0x4 LB: > { %s1116_s13 = sadd.s32 4294967295, %s1070_s12   ;;  %s663_s14 = sadd.s32 4294967294, %s1070_s12   ;;  %s1070_s12 = sphi %s1101_s12, %s1350_s12   ;;  %s1066_s11 = sphi %s1099_s11, %s1349_s11   ;;  %s1062_s10 = sphi %s1097_s10, %s1348_s10   ;;  %s1058_s9 = sphi %s1095_s9, %s1347_s9  }
   0x5   : > { %s1120_s15 = sadd.s32 1, %s1070_s12   ;;  %s70_s16 = sadd.s32 1, %s1066_s11 }
   0x6   : > { %s67_s17 = ssub.s32 %s1070_s12, %s1120_s15  ;;  %p80_p0 = scmp.ne.s32.totalorder %s1066_s11, %s1062_s10 }
   0x7   : > { %p68_p1 = scmp.eq.s32.totalorder %s67_s17, 0  ;;  %p81_p2 = scmp.eq.s32.totalorder %s1116_s13, 1 }
   0x8   : > { %p86_p3 = scmp.ne.s32.totalorder %s1062_s10, %s1058_s9  ;;  %p87_p4 = scmp.eq.s32.totalorder %s663_s14, 1 }
   0x9   : > { %s1131_s18 = scalar_select %p68_p1, %s1066_s11, %s70_s16  }
   0xa   : > { %p1133_p5 = por %p81_p2, %p80_p0  ;;  %p1137_p6 = por %p87_p4, %p86_p3 }
   0xb   : > { %p664_p7 = scmp.ge.s32.totalorder %s1070_s12, 1  ;;  %p94_p8 = scmp.lt.s32.totalorder %s1070_s12, 3 }
   0xc   : > { %s1338_s19 = scalar_select %p1133_p5, 1, 0 }
   0xd   : > { %s1339_s20 = scalar_select %p1137_p6, 1, 0 }
   0xe   : > { %p1335_p9 = scmp.eq.s32.totalorder %s1116_s13, 0  ;;  %p1144_p10 = pnand %p664_p7, %p94_p8 }
   0xf   : > { %s1072_s22 = smov [#allocation2]   ;;  %s976_s27 = scalar_lea.hbm %s1333_s1, 8192 }
  0x10   : > { %s1340_s21 = scalar_select %p1144_p10, 1, 0 }
  0x11   : > { %s106_s23 = sshll.u32 %s1072_s22, 4  ;;  %p924_p11 = pneg %p1144_p10  ;;  %s107_s23 = int_to_ptr.vmem [resolvable:$true] %s106_s23 }
  0x12   : > { %p977_p13 = scmp.ne.s32.totalorder %s1333_s1, %s976_s27  ;;  %p983_p3 = scmp.lt.u32.totalorder %s976_s27, %s1333_s1 }
  0x13   : > { %p1152_p12 = pnand %p1335_p9, %p924_p11 }
  0x15   : > { %p978_p0 = pneg %p1152_p12 }
  0x17   : > { %p979_p1 = pnand %p978_p0, %p977_p13 }
  0x19   : > { %p980_p2 = pneg %p979_p1 }
  0x1b   : > { %p985_p4 = pnand %p983_p3, %p980_p2 }
  0x1d   : > { %988 = shalt.err (!%p985_p4)
}
  0x1e   : > { %s989_s4 = scalar_lea.vmem %s107_s23, 8192  ;;  %p997_p9 = scmp.lt.s32.totalorder %s107_s23, %s107_s23 }
  0x1f   : > { %p990_p7 = scmp.ne.s32.totalorder %s107_s23, %s989_s4  ;;  %p998_p6 = scmp.lt.s32.totalorder %s989_s4, %s989_s4 }
  0x21   : > { %p992_p8 = pnand %p990_p7, %p978_p0  ;;  %p999_p5 = por %p998_p6, %p997_p9 }
  0x23   : > { %p993_p11 = pneg %p992_p8 }
  0x25   : > { %p1000_p10 = pnand %p999_p5, %p993_p11 }
  0x27   : > { %1003 = shalt.err (!%p1000_p10)
}
  0x28   : > { %s1073_s5 = smov 128   ;;  %s1074_s6 = smov 8  }
  0x29   : > { %927 = dma.hbm_to_vmem [thread:$0]  (!%p1152_p12), %s1333_s1, 8192, %s107_s23, [#allocation3], %s1073_s5, %s1073_s5, %s1074_s6  }
  0x2a   : > { %p1342_p13 = scmp.ne.s32.totalorder %s1340_s21, 0 }
  0x2b   : > { %p1343_p1 = scmp.eq.s32.totalorder (!%p1342_p13), %s1116_s13, 0 }
  0x2c   : > { %131 = sbr.rel (%p1342_p13) target bundleno = 449 (0x1c1), region = 28 }
  0x33   : > { %1049 = dma.done.wait (%p1343_p1), [#allocation3], 8192   ;;  %p1344_p0 = pmov %p1343_p1 }
  0x34   : > { %s670_s14 = sshll.u32 %s1116_s13, 3  ;;  %v1075_v0 = vmov 0   ;;  %v176_v5 = vld [vmem:[#allocation2 + $0x80] sm:$0xff]  ;;  %v177_v6 = vld [vmem:[#allocation2 + $0x88] sm:$0xff]  ;;  %v178_v18 = vld [vmem:[#allocation2 + $0x90] sm:$0xff]  ;;  %s150_s21 = sand.u32 1, %s1062_s10  }
  0x35   : > { %1051 = vsyncadd (%p1344_p0), [#allocation3], 4294959104  ;;  %975 = vset.pattern.permute.xlu1 %v1075_v0  ;;  %974 = vset.pattern.permute.xlu0 %v1075_v0  ;;  %p154_p5 = scmp.lt.s32.totalorder %s670_s14, 15  ;;  %v208_v7 = vld [vmem:[#allocation2 + $0x180] sm:$0xff]  ;;  %v209_v8 = vld [vmem:[#allocation2 + $0x188] sm:$0xff]  ;;  %v854_v11 = vpack.c.bf16 %v177_v6, %v176_v5  ;;  %s669_s24 = sshll.u32 %s150_s21, 6 }
  0x36   : > { %v886_v12 = vpack.c.bf16 %v209_v8, %v208_v7  ;;  %v160_v13 = vld [vmem:[#allocation2] sm:$0xff]  ;;  %v161_v14 = vld [vmem:[#allocation2 + $0x8] sm:$0xff]  ;;  %v179_v19 = vld [vmem:[#allocation2 + $0x98] sm:$0xff]  ;;  %s1270_s25 = scalar_lea.vmem [#allocation5], %s669_s24  ;;  %s741_s27 = sshll.u32 %s1116_s13, 10 }
  0x37   : > { %s1352_s14 = smov (!%p154_p5, %s670_s14), 15  ;;  %v192_v15 = vld [vmem:[#allocation2 + $0x100] sm:$0xff]  ;;  %v856_v16 = vpack.c.bf16 %v161_v14, %v160_v13  ;;  %v193_v17 = vld [vmem:[#allocation2 + $0x108] sm:$0xff]  ;;  %855 = vmatprep.subr.bf16.mxu0 %v854_v11  ;;  %v858_v21 = vpack.c.bf16 %v179_v19, %v178_v18  ;;  %v210_v22 = vld [vmem:[#allocation2 + $0x190] sm:$0xff]  ;;  %s589_s26 = sshll.u32 %s1270_s25, 4  ;;  %s1281_s26 = int_to_ptr.vmem [resolvable:$true] %s589_s26 }
  0x38   : > { %s671_s16 = sshll.u32 %s1352_s14, 3  ;;  %887 = vmatprep.subr.bf16.mxu1 %v886_v12  ;;  %v888_v20 = vpack.c.bf16 %v193_v17, %v192_v15  ;;  %v211_v23 = vld [vmem:[#allocation2 + $0x198] sm:$0xff]  ;;  %v162_v24 = vld [vmem:[#allocation2 + $0x10] sm:$0xff]  ;;  %v180_v33 = vld [vmem:[#allocation2 + $0xa0] sm:$0xff]  ;;  %s1286_s30 = scalar_lea.hbm %s1334_s2, %s741_s27 }
  0x39   : > { %s1182_s23 = scalar_lea.vmem %s1332_s0, %s671_s16  ;;  %857 = vmatpush3.bf16.msra.mxu0 %v856_v16  ;;  %v890_v25 = vpack.c.bf16 %v211_v23, %v210_v22  ;;  %v163_v26 = vld [vmem:[#allocation2 + $0x18] sm:$0xff]  ;;  %v194_v27 = vld [vmem:[#allocation2 + $0x110] sm:$0xff]  ;;  %v181_v34 = vld [vmem:[#allocation2 + $0xa8] sm:$0xff]  ;;  %s1291_s3 = scalar_lea.sflag [#allocation4], %s150_s21 }
  0x3a   : > { %v231_v1 = vld [vmem:[%s1182_s23 + $0x10] sm:$0xff]  ;;  %v229_v2 = vld [vmem:[%s1182_s23] sm:$0xff]  ;;  %v232_v3 = vld [vmem:[%s1182_s23 + $0x18] sm:$0xff]  ;;  %889 = vmatpush3.bf16.msra.mxu1 %v888_v20  ;;  %859 = vmatprep.subr.bf16.mxu0 %v858_v21  ;;  %v860_v31 = vpack.c.bf16 %v163_v26, %v162_v24  ;;  %v862_v36 = vpack.c.bf16 %v181_v34, %v180_v33  ;;  %s1004_s4 = scalar_lea.vmem %s1281_s26, 1024  ;;  %p1345_p9 = scmp.ne.s32.totalorder %s1338_s19, 0 }
  0x3b   : > { %244 = vperm.xlu1 %975, %v231_v1   ;;  %238 = vperm.xlu0 %974, %v229_v2   ;;  %v230_v4 = vld [vmem:[%s1182_s23 + $0x8] sm:$0xff]  ;;  %v233_v10 = vld [vmem:[%s1182_s23 + $0x20] sm:$0xff]  ;;  %v195_v28 = vld [vmem:[#allocation2 + $0x118] sm:$0xff]  ;;  %p1005_p6 = scmp.ne.s32.totalorder %s1281_s26, %s1004_s4  ;;  %s1077_s13 = smov [#allocation5]  }
  0x3c   : > { %v234_v9 = vld [vmem:[%s1182_s23 + $0x28] sm:$0xff]  ;;  %v236_v29 = vld [vmem:[%s1182_s23 + $0x38] sm:$0xff]  ;;  %v235_v30 = vld [vmem:[%s1182_s23 + $0x30] sm:$0xff]  ;;  %v892_v32 = vpack.c.bf16 %v195_v28, %v194_v27  ;;  %891 = vmatprep.subr.bf16.mxu1 %v890_v25  ;;  %s1008_s5 = sshll.u32 %s1077_s13, 4  ;;  %s1009_s5 = int_to_ptr.vmem [resolvable:$false] %s1008_s5 }
  0x3d   : > { %v212_v35 = vld [vmem:[#allocation2 + $0x1a0] sm:$0xff]  ;;  %v213_v37 = vld [vmem:[#allocation2 + $0x1a8] sm:$0xff]  ;;  %v182_v43 = vld [vmem:[#allocation2 + $0xb0] sm:$0xff]  ;;  %861 = vmatpush3.bf16.msra.mxu0 %v860_v31  ;;  %p1006_p10 = pnand %p1005_p6, %p1345_p9  ;;  %s1010_s6 = scalar_lea.vmem %s1009_s5, 2048 }
  0x3e   : > { %v164_v38 = vld [vmem:[#allocation2 + $0x20] sm:$0xff]  ;;  %v165_v39 = vld [vmem:[#allocation2 + $0x28] sm:$0xff]  ;;  %v894_v40 = vpack.c.bf16 %v213_v37, %v212_v35  ;;  %v183_v45 = vld [vmem:[#allocation2 + $0xb8] sm:$0xff]  ;;  %893 = vmatpush3.bf16.msra.mxu1 %v892_v32  ;;  %863 = vmatprep.subr.bf16.mxu0 %v862_v36  ;;  %p1011_p2 = scmp.lt.s32.totalorder %s1281_s26, %s1009_s5  ;;  %p1012_p3 = scmp.lt.s32.totalorder %s1010_s6, %s1004_s4 }
  0x3f   : > { %247 = vperm.xlu1 %975, %v232_v3   ;;  %241 = vperm.xlu0 %974, %v230_v4   ;;  %v196_v41 = vld [vmem:[#allocation2 + $0x120] sm:$0xff]  ;;  %v197_v42 = vld [vmem:[#allocation2 + $0x128] sm:$0xff]  ;;  %v864_v44 = vpack.c.bf16 %v165_v39, %v164_v38  ;;  %v214_v46 = vld [vmem:[#allocation2 + $0x1b0] sm:$0xff]  ;;  %v866_v49 = vpack.c.bf16 %v183_v45, %v182_v43  ;;  %p1007_p12 = pneg %p1006_p10 }
  0x40   : > { %v215_v47 = vld [vmem:[#allocation2 + $0x1b8] sm:$0xff]  ;;  %v896_v48 = vpack.c.bf16 %v197_v42, %v196_v41  ;;  %v166_v50 = vld [vmem:[#allocation2 + $0x30] sm:$0xff]  ;;  %v184_v55 = vld [vmem:[#allocation2 + $0xc0] sm:$0xff]  ;;  %895 = vmatprep.subr.bf16.mxu1 %v894_v40  ;;  %v224_v41 = vlaneseq  ;;  %p1013_p4 = por %p1012_p3, %p1011_p2 }
  0x41   : > { %v167_v51 = vld [vmem:[#allocation2 + $0x38] sm:$0xff]  ;;  %v198_v52 = vld [vmem:[#allocation2 + $0x130] sm:$0xff]  ;;  %v898_v53 = vpack.c.bf16 %v215_v47, %v214_v46  ;;  %v185_v56 = vld [vmem:[#allocation2 + $0xc8] sm:$0xff]  ;;  %865 = vmatpush3.bf16.msra.mxu0 %v864_v44  ;;  %v1076_v47 = vmov 1.0  }
  0x42   : > { %v199_v54 = vld [vmem:[#allocation2 + $0x138] sm:$0xff]  ;;  %v216_v57 = vld [vmem:[#allocation2 + $0x1c0] sm:$0xff]  ;;  %v217_v58 = vld [vmem:[#allocation2 + $0x1c8] sm:$0xff]  ;;  %v868_v59 = vpack.c.bf16 %v167_v51, %v166_v50  ;;  %897 = vmatpush3.bf16.msra.mxu1 %v896_v48  ;;  %867 = vmatprep.subr.bf16.mxu0 %v866_v49  ;;  %v870_v61 = vpack.c.bf16 %v185_v56, %v184_v55  ;;  %v1192_v42 = vand.u32 127, %v224_v41  ;;  %p1014_p7 = pnand %p1013_p4, %p1007_p12 }
  0x43   : > { %253 = vperm.xlu1 %975, %v234_v9   ;;  %250 = vperm.xlu0 %974, %v233_v10   ;;  %v900_v60 = vpack.c.bf16 %v199_v54, %v198_v52  ;;  %v168_v62 = vld [vmem:[#allocation2 + $0x40] sm:$0xff]  ;;  %v169_v63 = vld [vmem:[#allocation2 + $0x48] sm:$0xff]  ;;  %v902_v1 = vpack.c.bf16 %v217_v58, %v216_v57  ;;  %v186_v3 = vld [vmem:[#allocation2 + $0xd0] sm:$0xff] }
  0x44   : > { %v200_v0 = vld [vmem:[#allocation2 + $0x140] sm:$0xff]  ;;  %899 = vmatprep.subr.bf16.mxu1 %v898_v53  ;;  %v201_v2 = vld [vmem:[#allocation2 + $0x148] sm:$0xff]  ;;  %v187_v4 = vld [vmem:[#allocation2 + $0xd8] sm:$0xff]  ;;  %v872_v7 = vpack.c.bf16 %v169_v63, %v168_v62  ;;  %v1195_v43 = vadd.s32 128, %v1192_v42  ;;  %v1198_v44 = vadd.s32 384, %v1192_v42  ;;  %v1201_v45 = vadd.s32 256, %v1192_v42 }
  0x45   : > { %v218_v5 = vld [vmem:[#allocation2 + $0x1d0] sm:$0xff]  ;;  %v219_v6 = vld [vmem:[#allocation2 + $0x1d8] sm:$0xff]  ;;  %869 = vmatpush3.bf16.msra.mxu0 %v868_v59  ;;  %v904_v8 = vpack.c.bf16 %v201_v2, %v200_v0  ;;  %v874_v9 = vpack.c.bf16 %v187_v4, %v186_v3  ;;  %v188_v15 = vld [vmem:[#allocation2 + $0xe0] sm:$0xff] }
  0x46   : > { %901 = vmatpush3.bf16.msra.mxu1 %v900_v60  ;;  %871 = vmatprep.subr.bf16.mxu0 %v870_v61  ;;  %v170_v10 = vld [vmem:[#allocation2 + $0x50] sm:$0xff]  ;;  %v171_v11 = vld [vmem:[#allocation2 + $0x58] sm:$0xff]  ;;  %v906_v13 = vpack.c.bf16 %v219_v6, %v218_v5  ;;  %v189_v16 = vld [vmem:[#allocation2 + $0xe8] sm:$0xff] }
  0x47   : > { %259 = vperm.xlu1 %975, %v236_v29   ;;  %256 = vperm.xlu0 %974, %v235_v30   ;;  %v202_v12 = vld [vmem:[#allocation2 + $0x150] sm:$0xff]  ;;  %v203_v14 = vld [vmem:[#allocation2 + $0x158] sm:$0xff]  ;;  %v220_v17 = vld [vmem:[#allocation2 + $0x1e0] sm:$0xff]  ;;  %v876_v19 = vpack.c.bf16 %v171_v11, %v170_v10  ;;  %v878_v21 = vpack.c.bf16 %v189_v16, %v188_v15 }
  0x48   : > { %903 = vmatprep.subr.bf16.mxu1 %v902_v1  ;;  %v221_v18 = vld [vmem:[#allocation2 + $0x1e8] sm:$0xff]  ;;  %v908_v20 = vpack.c.bf16 %v203_v14, %v202_v12  ;;  %v172_v22 = vld [vmem:[#allocation2 + $0x60] sm:$0xff]  ;;  %v190_v27 = vld [vmem:[#allocation2 + $0xf0] sm:$0xff] }
  0x49   : > { %873 = vmatpush3.bf16.msra.mxu0 %v872_v7  ;;  %v173_v23 = vld [vmem:[#allocation2 + $0x68] sm:$0xff]  ;;  %v204_v24 = vld [vmem:[#allocation2 + $0x160] sm:$0xff]  ;;  %v910_v25 = vpack.c.bf16 %v221_v18, %v220_v17  ;;  %v191_v28 = vld [vmem:[#allocation2 + $0xf8] sm:$0xff] }
  0x4a   : > { %905 = vmatpush3.bf16.msra.mxu1 %v904_v8  ;;  %875 = vmatprep.subr.bf16.mxu0 %v874_v9  ;;  %v205_v26 = vld [vmem:[#allocation2 + $0x168] sm:$0xff]  ;;  %v222_v29 = vld [vmem:[#allocation2 + $0x1f0] sm:$0xff]  ;;  %v223_v30 = vld [vmem:[#allocation2 + $0x1f8] sm:$0xff]  ;;  %v880_v31 = vpack.c.bf16 %v173_v23, %v172_v22  ;;  %v882_v33 = vpack.c.bf16 %v191_v28, %v190_v27 }
  0x4b   : > { %907 = vmatprep.subr.bf16.mxu1 %v906_v13  ;;  %v912_v32 = vpack.c.bf16 %v205_v26, %v204_v24  ;;  %v174_v34 = vld [vmem:[#allocation2 + $0x70] sm:$0xff]  ;;  %v175_v35 = vld [vmem:[#allocation2 + $0x78] sm:$0xff]  ;;  %v914_v36 = vpack.c.bf16 %v223_v30, %v222_v29 }
  0x4c   : > { %v206_v37 = vld [vmem:[#allocation2 + $0x170] sm:$0xff]  ;;  %v207_v38 = vld [vmem:[#allocation2 + $0x178] sm:$0xff]  ;;  %v884_v39 = vpack.c.bf16 %v175_v35, %v174_v34 }
  0x4d   : > { %877 = vmatpush3.bf16.msra.mxu0 %v876_v19  ;;  %v916_v40 = vpack.c.bf16 %v207_v38, %v206_v37 }
  0x4e   : > { %909 = vmatpush3.bf16.msra.mxu1 %v908_v20  ;;  %879 = vmatprep.subr.bf16.mxu0 %v878_v21 }
  0x4f   : > { %911 = vmatprep.subr.bf16.mxu1 %v910_v25 }
  0x51   : > { %881 = vmatpush3.bf16.msra.mxu0 %v880_v31 }
  0x52   : > { %913 = vmatpush3.bf16.msra.mxu1 %v912_v32  ;;  %883 = vmatprep.subr.bf16.mxu0 %v882_v33 }
  0x53   : > { %915 = vmatprep.subr.bf16.mxu1 %v914_v36 }
  0x55   : > { %885 = vmatpush3.bf16.msra.mxu0 %v884_v39 }
  0x56   : > { %917 = vmatpush3.bf16.msra.mxu1 %v916_v40 }
  0xba   : > { %v239_v46 = vpop.permute.xlu0 %238  ;;  %v245_v48 = vpop.permute.xlu1 %244 }
  0xbb   : > { %vm262_vm0 = vcmp.eq.s32.totalorder %v239_v46, %v1195_v43  ;;  %vm264_vm1 = vcmp.eq.s32.totalorder %v239_v46, %v1198_v44  ;;  %vm261_vm2 = vcmp.eq.s32.totalorder %v239_v46, %v1192_v42  ;;  %vm263_vm3 = vcmp.eq.s32.totalorder %v239_v46, %v1201_v45 }
  0xbc   : > { %704 = vmatprep.mubr.msk.f32.mxu0 %vm262_vm0, %v1076_v47  ;;  %720 = vmatprep.mubr.msk.f32.mxu1 %vm264_vm1, %v1076_v47  ;;  %vm270_vm4 = vcmp.eq.s32.totalorder %v245_v48, %v1195_v43  ;;  %vm272_vm5 = vcmp.eq.s32.totalorder %v245_v48, %v1198_v44  ;;  %vm269_vm10 = vcmp.eq.s32.totalorder %v245_v48, %v1192_v42 }
  0xbd   : > { %705 = vmatmul.mubr.msk.f32.vlgmr.msra.gmra.mrb[0].mxu0 %vm261_vm2, %v1076_v47  ;;  %721 = vmatmul.mubr.msk.f32.vlgmr.msra.gmra.mrb[0].mxu1 %vm263_vm3, %v1076_v47  ;;  %vm271_vm11 = vcmp.eq.s32.totalorder %v245_v48, %v1201_v45 }
  0xbe   : > { %v242_v49 = vpop.permute.xlu0 %241  ;;  %v248_v50 = vpop.permute.xlu1 %247 }
  0xbf   : > { %vm266_vm6 = vcmp.eq.s32.totalorder %v242_v49, %v1195_v43  ;;  %vm268_vm7 = vcmp.eq.s32.totalorder %v242_v49, %v1198_v44  ;;  %vm265_vm8 = vcmp.eq.s32.totalorder %v242_v49, %v1192_v42  ;;  %vm267_vm9 = vcmp.eq.s32.totalorder %v242_v49, %v1201_v45 }
  0xc0   : > { %706 = vmatprep.mubr.msk.f32.mxu0 %vm266_vm6, %v1076_v47  ;;  %722 = vmatprep.mubr.msk.f32.mxu1 %vm268_vm7, %v1076_v47  ;;  %vm274_vm12 = vcmp.eq.s32.totalorder %v248_v50, %v1195_v43  ;;  %vm276_vm13 = vcmp.eq.s32.totalorder %v248_v50, %v1198_v44  ;;  %vm273_vm14 = vcmp.eq.s32.totalorder %v248_v50, %v1192_v42 }
  0xc1   : > { %707 = vmatmul.mubr.msk.f32.gmra.mrb[2].mxu0 %vm265_vm8, %v1076_v47  ;;  %723 = vmatmul.mubr.msk.f32.gmra.mrb[2].mxu1 %vm267_vm9, %v1076_v47  ;;  %vm275_vm15 = vcmp.eq.s32.totalorder %v248_v50, %v1201_v45 }
  0xc2   : > { %708 = vmatprep.mubr.msk.f32.mxu0 %vm270_vm4, %v1076_v47  ;;  %724 = vmatprep.mubr.msk.f32.mxu1 %vm272_vm5, %v1076_v47  ;;  %v251_v51 = vpop.permute.xlu0 %250  ;;  %v254_v52 = vpop.permute.xlu1 %253 }
  0xc3   : > { %vm278_vm0 = vcmp.eq.s32.totalorder %v251_v51, %v1195_v43  ;;  %vm280_vm1 = vcmp.eq.s32.totalorder %v251_v51, %v1198_v44  ;;  %vm277_vm2 = vcmp.eq.s32.totalorder %v251_v51, %v1192_v42  ;;  %vm279_vm3 = vcmp.eq.s32.totalorder %v251_v51, %v1201_v45 }
  0xc4   : > { %vm282_vm4 = vcmp.eq.s32.totalorder %v254_v52, %v1195_v43  ;;  %vm284_vm5 = vcmp.eq.s32.totalorder %v254_v52, %v1198_v44  ;;  %vm281_vm6 = vcmp.eq.s32.totalorder %v254_v52, %v1192_v42  ;;  %vm283_vm7 = vcmp.eq.s32.totalorder %v254_v52, %v1201_v45 }
  0xc5   : > { %709 = vmatmul.mubr.msk.f32.gmra.mrb[4].mxu0 %vm269_vm10, %v1076_v47  ;;  %725 = vmatmul.mubr.msk.f32.gmra.mrb[4].mxu1 %vm271_vm11, %v1076_v47 }
  0xc6   : > { %710 = vmatprep.mubr.msk.f32.mxu0 %vm274_vm12, %v1076_v47  ;;  %726 = vmatprep.mubr.msk.f32.mxu1 %vm276_vm13, %v1076_v47  ;;  %v257_v53 = vpop.permute.xlu0 %256  ;;  %v260_v54 = vpop.permute.xlu1 %259 }
  0xc7   : > { %vm286_vm8 = vcmp.eq.s32.totalorder %v257_v53, %v1195_v43  ;;  %vm288_vm9 = vcmp.eq.s32.totalorder %v257_v53, %v1198_v44  ;;  %vm285_vm10 = vcmp.eq.s32.totalorder %v257_v53, %v1192_v42  ;;  %vm287_vm11 = vcmp.eq.s32.totalorder %v257_v53, %v1201_v45 }
  0xc8   : > { %vm290_vm12 = vcmp.eq.s32.totalorder %v260_v54, %v1195_v43  ;;  %vm292_vm13 = vcmp.eq.s32.totalorder %v260_v54, %v1198_v44 }
  0xc9   : > { %711 = vmatmul.mubr.msk.f32.gmra.mrb[6].mxu0 %vm273_vm14, %v1076_v47  ;;  %727 = vmatmul.mubr.msk.f32.gmra.mrb[6].mxu1 %vm275_vm15, %v1076_v47  ;;  %vm289_vm14 = vcmp.eq.s32.totalorder %v260_v54, %v1192_v42  ;;  %vm291_vm15 = vcmp.eq.s32.totalorder %v260_v54, %v1201_v45 }
  0xca   : > { %712 = vmatprep.mubr.msk.f32.mxu0 %vm278_vm0, %v1076_v47  ;;  %728 = vmatprep.mubr.msk.f32.mxu1 %vm280_vm1, %v1076_v47 }
  0xcd   : > { %713 = vmatmul.mubr.msk.f32.gmra.mrb[8].mxu0 %vm277_vm2, %v1076_v47  ;;  %729 = vmatmul.mubr.msk.f32.gmra.mrb[8].mxu1 %vm279_vm3, %v1076_v47 }
  0xce   : > { %714 = vmatprep.mubr.msk.f32.mxu0 %vm282_vm4, %v1076_v47  ;;  %730 = vmatprep.mubr.msk.f32.mxu1 %vm284_vm5, %v1076_v47 }
  0xd1   : > { %715 = vmatmul.mubr.msk.f32.gmra.mrb[10].mxu0 %vm281_vm6, %v1076_v47  ;;  %731 = vmatmul.mubr.msk.f32.gmra.mrb[10].mxu1 %vm283_vm7, %v1076_v47 }
  0xd2   : > { %716 = vmatprep.mubr.msk.f32.mxu0 %vm286_vm8, %v1076_v47  ;;  %732 = vmatprep.mubr.msk.f32.mxu1 %vm288_vm9, %v1076_v47 }
  0xd5   : > { %717 = vmatmul.mubr.msk.f32.gmra.mrb[12].mxu0 %vm285_vm10, %v1076_v47  ;;  %733 = vmatmul.mubr.msk.f32.gmra.mrb[12].mxu1 %vm287_vm11, %v1076_v47 }
  0xd6   : > { %718 = vmatprep.mubr.msk.f32.mxu0 %vm290_vm12, %v1076_v47  ;;  %734 = vmatprep.mubr.msk.f32.mxu1 %vm292_vm13, %v1076_v47 }
  0xd9   : > { %719 = vmatmul.mubr.msk.f32.gmra.mrb[14].mxu0 %vm289_vm14, %v1076_v47  ;;  %735 = vmatmul.mubr.msk.f32.gmra.mrb[14].mxu1 %vm291_vm15, %v1076_v47 }
 0x190   : > { %v774_v55 = vpop.f32.mrb[0].mxu0  ;;  %v830_v56 = vpop.f32.mrb[0].mxu1 }
 0x191   : > { %v775_v57 = vpop.f32.mrb[1].mxu0  ;;  %v831_v58 = vpop.f32.mrb[1].mxu1 }
 0x192   : > { %v776_v59 = vadd.f32 %v775_v57, %v774_v55  ;;  %v832_v60 = vadd.f32 %v831_v58, %v830_v56 }
 0x194   : > { %v529_v61 = vadd.f32 %v832_v60, %v776_v59  ;;  %v777_v62 = vpop.f32.mrb[2].mxu0  ;;  %v833_v63 = vpop.f32.mrb[2].mxu1 }
 0x195   : > { %v778_v0 = vpop.f32.mrb[3].mxu0  ;;  %v834_v1 = vpop.f32.mrb[3].mxu1 }
 0x196   : > { %567 = vst [vmem:[%s1270_s25] sm:$0xff] %v529_v61  ;;  %v779_v2 = vadd.f32 %v778_v0, %v777_v62  ;;  %v835_v3 = vadd.f32 %v834_v1, %v833_v63 }
 0x198   : > { %v534_v4 = vadd.f32 %v835_v3, %v779_v2  ;;  %v780_v5 = vpop.f32.mrb[4].mxu0  ;;  %v836_v6 = vpop.f32.mrb[4].mxu1 }
 0x199   : > { %v781_v7 = vpop.f32.mrb[5].mxu0  ;;  %v837_v8 = vpop.f32.mrb[5].mxu1 }
 0x19a   : > { %568 = vst [vmem:[%s1270_s25 + $0x8] sm:$0xff] %v534_v4  ;;  %v782_v9 = vadd.f32 %v781_v7, %v780_v5  ;;  %v838_v10 = vadd.f32 %v837_v8, %v836_v6 }
 0x19c   : > { %v539_v11 = vadd.f32 %v838_v10, %v782_v9  ;;  %v783_v12 = vpop.f32.mrb[6].mxu0  ;;  %v839_v13 = vpop.f32.mrb[6].mxu1 }
 0x19d   : > { %v784_v14 = vpop.f32.mrb[7].mxu0  ;;  %v840_v15 = vpop.f32.mrb[7].mxu1 }
 0x19e   : > { %569 = vst [vmem:[%s1270_s25 + $0x10] sm:$0xff] %v539_v11  ;;  %v785_v16 = vadd.f32 %v784_v14, %v783_v12  ;;  %v841_v17 = vadd.f32 %v840_v15, %v839_v13 }
 0x1a0   : > { %v544_v18 = vadd.f32 %v841_v17, %v785_v16  ;;  %v786_v19 = vpop.f32.mrb[8].mxu0  ;;  %v842_v20 = vpop.f32.mrb[8].mxu1 }
 0x1a1   : > { %v787_v21 = vpop.f32.mrb[9].mxu0  ;;  %v843_v22 = vpop.f32.mrb[9].mxu1 }
 0x1a2   : > { %570 = vst [vmem:[%s1270_s25 + $0x18] sm:$0xff] %v544_v18  ;;  %v788_v23 = vadd.f32 %v787_v21, %v786_v19  ;;  %v844_v24 = vadd.f32 %v843_v22, %v842_v20 }
 0x1a4   : > { %v549_v25 = vadd.f32 %v844_v24, %v788_v23  ;;  %v789_v26 = vpop.f32.mrb[10].mxu0  ;;  %v845_v27 = vpop.f32.mrb[10].mxu1 }
 0x1a5   : > { %v790_v28 = vpop.f32.mrb[11].mxu0  ;;  %v846_v29 = vpop.f32.mrb[11].mxu1 }
 0x1a6   : > { %571 = vst [vmem:[%s1270_s25 + $0x20] sm:$0xff] %v549_v25  ;;  %v791_v30 = vadd.f32 %v790_v28, %v789_v26  ;;  %v847_v31 = vadd.f32 %v846_v29, %v845_v27 }
 0x1a8   : > { %v554_v32 = vadd.f32 %v847_v31, %v791_v30  ;;  %v792_v33 = vpop.f32.mrb[12].mxu0  ;;  %v848_v34 = vpop.f32.mrb[12].mxu1 }
 0x1a9   : > { %v793_v35 = vpop.f32.mrb[13].mxu0  ;;  %v849_v36 = vpop.f32.mrb[13].mxu1 }
 0x1aa   : > { %572 = vst [vmem:[%s1270_s25 + $0x28] sm:$0xff] %v554_v32  ;;  %v794_v37 = vadd.f32 %v793_v35, %v792_v33  ;;  %v850_v38 = vadd.f32 %v849_v36, %v848_v34 }
 0x1ac   : > { %v559_v39 = vadd.f32 %v850_v38, %v794_v37  ;;  %v795_v40 = vpop.f32.mrb[14].mxu0  ;;  %v851_v41 = vpop.f32.mrb[14].mxu1 }
 0x1ad   : > { %v796_v42 = vpop.f32.mrb[15].mxu0  ;;  %v852_v43 = vpop.f32.mrb[15].mxu1 }
 0x1ae   : > { %573 = vst [vmem:[%s1270_s25 + $0x30] sm:$0xff] %v559_v39  ;;  %v797_v44 = vadd.f32 %v796_v42, %v795_v40  ;;  %v853_v45 = vadd.f32 %v852_v43, %v851_v41 }
 0x1b0   : > { %v564_v46 = vadd.f32 %v853_v45, %v797_v44 }
 0x1b2   : > { %574 = vst [vmem:[%s1270_s25 + $0x38] sm:$0xff] %v564_v46 }
 0x1b3   : > { %1017 = shalt.err (!%p1014_p7)
}
 0x1b4   : > { %s1018_s7 = scalar_lea.hbm %s1286_s30, 1024  ;;  %s1022_s16 = scalar_lea.hbm %s1334_s2, 2048 }
 0x1b5   : > { %p1019_p8 = scmp.ne.s32.totalorder %s1286_s30, %s1018_s7  ;;  %p1023_p1 = scmp.lt.u32.totalorder %s1286_s30, %s1334_s2 }
 0x1b6   : > { %p1024_p0 = scmp.lt.u32.totalorder %s1022_s16, %s1018_s7  ;;  %p1026_p6 = scmp.lt.u32.totalorder %s1018_s7, %s1286_s30 }
 0x1b7   : > { %p1020_p11 = pnand %p1019_p8, %p1345_p9 }
 0x1b8   : > { %p1025_p5 = por %p1024_p0, %p1023_p1 }
 0x1b9   : > { %p1021_p13 = pneg %p1020_p11 }
 0x1ba   : > { %p1027_p10 = por %p1026_p6, %p1025_p5 }
 0x1bc   : > { %p1028_p12 = pnand %p1027_p10, %p1021_p13 }
 0x1be   : > { %1031 = shalt.err (!%p1028_p12)
}
 0x1bf   : > { %s1078_s23 = smov 128   ;;  %s1079_s21 = smov 8  }
 0x1c0   : > { %922 = dma.vmem_to_hbm [thread:$0]  (%p1345_p9), %s1281_s26, 1024, %s1286_s30, %s1291_s3, %s1078_s23, %s1078_s23, %s1079_s21  }
 0x1c1 PF: > { %p934_p2 = scmp.ge.s32.totalorder %s1070_s12, 2  ;;  %s604_s24 = sand.u32 1, %s1058_s9  }
 0x1c2   : > { %p1346_p3 = scmp.ne.s32.totalorder %s1339_s20, 0  ;;  %s605_s25 = scalar_lea.sflag [#allocation4], %s604_s24 }
 0x1c4   : > { %p929_p4 = pnand %p934_p2, %p1346_p3 }
 0x1c6   : > { %1053 = dma.done.wait (!%p929_p4), %s605_s25, 1024  }
 0x1c7   : > { %1055 = vsyncadd (!%p929_p4), %s605_s25, 4294966272  ;;  %p13_p7 = scmp.ge.s32.totalorder %s1120_s15, 4   ;;  %s1347_s9 = smov %s1062_s10 }
 0x1c8   : > { %s1348_s10 = smov %s1066_s11  ;;  %s1349_s11 = smov %s1131_s18 }
 0x1c9   : > { %s1350_s12 = smov %s1120_s15  ;;  %15 = sbr.rel (!%p13_p7) target bundleno = 4 (0x4), region = 68 }
 0x1d0   :  { %610 = vsyncpa [#allocation3], 1 }
 0x1d1   :  { %612 = vsyncpa [#allocation3 + $0x1], 1 }
 0x1d2   :  { %613 = vsyncpa [#allocation4], 1 }
 0x1d3   :  { %615 = vsyncpa [#allocation4 + $0x1], 1 }

</bundles_post_ra>
